<compile_context>
chip_gen: v6e
topology: v6e:2x2x1
jax: 0.10.0
libtpu: 0.0.40
codegen_flags: <defaults>
</compile_context>

<pallas_src>
import jax
import jax.numpy as jnp
from jax import lax
from jax.experimental import pallas as pl
from jax.experimental.pallas import tpu as pltpu

LN_EPS = 1e-5
LANE = 128
SUBLANE = 8


def _round_up(x, m):
    return (x + m - 1) // m * m


def _tpu_vmem_bytes():
    """Physical per-core VMEM bytes; conservative v7x default if the query fails."""
    try:
        info = pltpu.get_tpu_info()
        vmem = getattr(info, "vmem_capacity_bytes", None)
        if vmem:
            return int(vmem)
    except Exception:
        pass
    return 64 << 20


def _single_buffer_supported():
    if not hasattr(pl, "Buffered"):
        return False
    try:
        pl.BlockSpec((8, 128), lambda i, k: (0, 0), pipeline_mode=pl.Buffered(1))
        return True
    except (TypeError, ValueError):
        return False


def _pick_tile_k(d_model, hidden, vmem_cap):
    """K tile for streaming W1; keep W1 resident when it's a small VMEM fraction."""
    if d_model * hidden * 2 <= vmem_cap // 4:
        return d_model
    for tk in (2048, 1024, 512, 256, 128):
        if d_model % tk == 0:
            return tk
    # TODO(synk): ragged K tiles would accumulate OOB garbage into real rows;
    # fall back to a resident W1 when no multiple-of-128 divisor exists.
    return d_model


def _vmem_estimate(tile_n, tile_k, hidden, n_out_pad, nk, single_buffer_weights):
    """Explicit per-buffer VMEM accounting for the chosen spec path (bytes)."""
    w_bufs = 1 if single_buffer_weights else 2
    w1_bufs = w_bufs if nk == 1 else 2          # streamed W1 is double-buffered
    return (2 * tile_n * tile_k * 2              # x tiles (bf16, double-buffered)
            + w1_bufs * tile_k * hidden * 2      # W1 (bf16)
            + w_bufs * (3 * hidden + n_out_pad) * 4   # b1 / gamma / beta / b2 (f32)
            + w_bufs * hidden * n_out_pad * 2    # W2 (bf16, padded N)
            + 2 * tile_n * n_out_pad * 4         # out tiles (f32, double-buffered)
            + tile_n * hidden * 4                # f32 accumulator scratch
            + 3 * tile_n * hidden * 4)           # f32 temporaries headroom


def decoder_kernel(x_ref, w1_ref, b1_ref, gamma_ref, beta_ref, w2_ref, b2_ref,
                   o_ref, h_acc_ref):
    k = pl.program_id(1)

    @pl.when(k == 0)
    def _():
        h_acc_ref[...] = jnp.zeros_like(h_acc_ref)

    # fc1 partial product on the MXU: bf16 x bf16 -> f32 accumulation over K tiles.
    h_acc_ref[...] += jnp.dot(x_ref[...], w1_ref[...],
                              preferred_element_type=jnp.float32)

    @pl.when(k == pl.num_programs(1) - 1)
    def _():
        h = h_acc_ref[...] + b1_ref[...]
        h = jnp.maximum(h, 0.0)                 # ReLU
        # Dropout (eval mode) == identity.

        # LayerNorm over the hidden dim with fused statistics (one pass over h).
        hid = h.shape[-1]
        s1 = jnp.sum(h, axis=-1, keepdims=True)
        s2 = jnp.sum(h * h, axis=-1, keepdims=True)
        mean = s1 * (1.0 / hid)
        var = jnp.maximum(s2 * (1.0 / hid) - mean * mean, 0.0)
        inv_std = lax.rsqrt(var + LN_EPS)
        h = (h - mean) * (inv_std * gamma_ref[...]) + beta_ref[...]

        # fc2 on the MXU: bf16 inputs, f32 accumulation, lane-dense padded N tile.
        out = jnp.dot(h.astype(jnp.bfloat16), w2_ref[...],
                      preferred_element_type=jnp.float32)
        # Dropout (eval mode) == identity.
        o_ref[...] = out + b2_ref[...]


def _build_specs(tile_n, tile_k, hidden, n_out_pad, nk, single_buffer_weights):
    def const_spec(shape):
        if single_buffer_weights:
            # Constant index_map -> resident block; single-buffer halves VMEM use.
            return pl.BlockSpec(shape, lambda i, k: (0, 0),
                                pipeline_mode=pl.Buffered(1))
        return pl.BlockSpec(shape, lambda i, k: (0, 0))

    if nk == 1:
        w1_spec = const_spec((tile_k, hidden))
    else:
        # W1 streamed along K -> keep default double-buffering so the DMA pipelines.
        w1_spec = pl.BlockSpec((tile_k, hidden), lambda i, k: (k, 0))

    in_specs = [
        pl.BlockSpec((tile_n, tile_k), lambda i, k: (i, k)),   # x rows (pipelined)
        w1_spec,                                               # W1^T (bf16)
        const_spec((1, hidden)),                               # b1
        const_spec((1, hidden)),                               # LN gamma
        const_spec((1, hidden)),                               # LN beta
        const_spec((hidden, n_out_pad)),                       # W2^T (bf16, padded N)
        const_spec((1, n_out_pad)),                            # b2 (padded N)
    ]
    out_specs = pl.BlockSpec((tile_n, n_out_pad), lambda i, k: (i, 0))
    return in_specs, out_specs


def linear_decoder2(x, params, *, tile_rows=None):
    """x: (batch, seq, d_model) or (N, d_model). Returns same leading dims with n_class last."""
    w1, b1, gamma, beta, w2, b2 = params
    d_model, hidden = w1.shape
    n_class = w2.shape[1]

    lead_shape = x.shape[:-1]
    x2d = x.reshape(-1, d_model)
    n_rows = x2d.shape[0]

    # Generation-aware VMEM budget and default row tile.
    vmem_phys = _tpu_vmem_bytes()
    vmem_cap = int(min((vmem_phys * 3) // 4, 100 << 20))     # 48 MiB v7x, 96 MiB v5e/v6e
    if tile_rows is None:
        tile_rows = 512 if vmem_phys >= (100 << 20) else 256

    # Row tile: large for throughput, but split so there are >= 2 row tiles when
    # possible (lets dimension_semantics=("parallel", ...) shard across v7x's 2 TCs).
    tile_n = min(_round_up(tile_rows, SUBLANE),
                 _round_up(max((n_rows + 1) // 2, 1), SUBLANE))
    tile_n = max(tile_n, SUBLANE)

    tile_k = _pick_tile_k(d_model, hidden, vmem_cap)
    nk = d_model // tile_k

    # Lane-dense output: pad n_class up to a multiple of 128.
    n_out_pad = _round_up(n_class, LANE)

    single_buffer = _single_buffer_supported()

    # Shrink the row tile if the budget estimate would exceed the cap.
    while (tile_n > SUBLANE and
           2 * _vmem_estimate(tile_n, tile_k, hidden, n_out_pad, nk, single_buffer)
           > vmem_cap):
        tile_n = max(_round_up(tile_n // 2, SUBLANE), SUBLANE)

    grid = (pl.cdiv(n_rows, tile_n), nk)

    # bf16 matmul operands (no row padding of x); LN params / biases stay f32.
    x_b = x2d if x2d.dtype == jnp.bfloat16 else x2d.astype(jnp.bfloat16)
    w1_b = w1.astype(jnp.bfloat16)
    w2_p = jnp.zeros((hidden, n_out_pad), jnp.bfloat16).at[:, :n_class].set(
        w2.astype(jnp.bfloat16))
    b2_p = jnp.zeros((1, n_out_pad), jnp.float32).at[:, :n_class].set(
        b2.astype(jnp.float32))
    b1_f = b1.astype(jnp.float32)
    gamma_f = gamma.astype(jnp.float32)
    beta_f = beta.astype(jnp.float32)

    def run(use_single_buffer):
        in_specs, out_specs = _build_specs(
            tile_n, tile_k, hidden, n_out_pad, nk, use_single_buffer)
        est = _vmem_estimate(tile_n, tile_k, hidden, n_out_pad, nk, use_single_buffer)
        vmem_limit = int(min(max(2 * est, 16 << 20), vmem_cap))
        return pl.pallas_call(
            decoder_kernel,
            out_shape=jax.ShapeDtypeStruct((n_rows, n_out_pad), jnp.float32),
            grid_spec=pltpu.PrefetchScalarGridSpec(
                num_scalar_prefetch=0,
                grid=grid,
                in_specs=in_specs,
                out_specs=out_specs,
                scratch_shapes=[pltpu.VMEM((tile_n, hidden), jnp.float32)],
            ),
            compiler_params=pltpu.CompilerParams(
                dimension_semantics=("parallel", "arbitrary"),
                vmem_limit_bytes=vmem_limit,
            ),
        )(x_b, w1_b, b1_f, gamma_f, beta_f, w2_p, b2_p)

    if single_buffer:
        try:
            out_pad = run(True)
        except pltpu.LoweringException:
            # Only fall back if single-buffered constant operands fail to lower.
            out_pad = run(False)
    else:
        out_pad = run(False)

    out = out_pad[:, :n_class] if n_out_pad != n_class else out_pad
    return out.reshape(*lead_shape, n_class)


def init_params(key, d_model, n_class):
    """Deterministic synthetic parameters matching LinearDecoder2's shapes.

    PyTorch: fc1.weight (hidden, d_model), fc1.bias (hidden,),
             norm1.weight/bias (hidden,), fc2.weight (n_class, hidden), fc2.bias (n_class,)
    Linear weights are stored pre-transposed as (in, out) for the kernel.
    """
    hidden = d_model // 2
    k1, k2, k3, k4 = jax.random.split(key, 4)
    bound1 = 1.0 / (d_model ** 0.5)
    bound2 = 1.0 / (hidden ** 0.5)
    w1 = jax.random.uniform(k1, (d_model, hidden), jnp.float32, -bound1, bound1)
    b1 = jax.random.uniform(k2, (1, hidden), jnp.float32, -bound1, bound1)
    gamma = jnp.ones((1, hidden), jnp.float32)
    beta = jnp.zeros((1, hidden), jnp.float32)
    w2 = jax.random.uniform(k3, (hidden, n_class), jnp.float32, -bound2, bound2)
    b2 = jax.random.uniform(k4, (1, n_class), jnp.float32, -bound2, bound2)
    return (w1, b1, gamma, beta, w2, b2)


def reference(x, params):
    """Pure-JAX f32 reference of the eval-mode forward for sanity checking."""
    w1, b1, gamma, beta, w2, b2 = params
    x = x.astype(jnp.float32)
    h = x @ w1 + b1
    h = jnp.maximum(h, 0.0)
    mean = jnp.mean(h, axis=-1, keepdims=True)
    var = jnp.mean((h - mean) ** 2, axis=-1, keepdims=True)
    h = (h - mean) / jnp.sqrt(var + LN_EPS) * gamma + beta
    return h @ w2 + b2


if __name__ == "__main__":
    batch, seq, d_model, n_class = 2, 8, 32, 4
    dropout = 0.1  # unused at inference (identity)

    key = jax.random.PRNGKey(0)
    kx, kp = jax.random.split(key)
    x = jax.random.normal(kx, (batch, seq, d_model), dtype=jnp.float32)
    params = init_params(kp, d_model, n_class)

    out = linear_decoder2(x, params)
    out = jax.block_until_ready(out)

    ref = reference(x.reshape(-1, d_model), params).reshape(batch, seq, n_class)
    assert out.shape == (batch, seq, n_class)
    max_err = float(jnp.max(jnp.abs(out - ref)))
    # bf16 matmul inputs with f32 accumulation -> slightly looser tolerance vs f32 reference.
    assert jnp.allclose(out, ref, atol=5e-2, rtol=5e-2), f"mismatch vs reference (max abs err {max_err})"

    print("KERNEL_OK")
</pallas_src>

<mosaic_0001>
module attributes {stable_mosaic.version = 11 : i64} {
  func.func @decoder_kernel(%arg0: i32, %arg1: i32, %arg2: memref<8x32xbf16, #tpu.memory_space<vmem>>, %arg3: memref<32x16xbf16, #tpu.memory_space<vmem>>, %arg4: memref<1x16xf32, #tpu.memory_space<vmem>>, %arg5: memref<1x16xf32, #tpu.memory_space<vmem>>, %arg6: memref<1x16xf32, #tpu.memory_space<vmem>>, %arg7: memref<16x128xbf16, #tpu.memory_space<vmem>>, %arg8: memref<1x128xf32, #tpu.memory_space<vmem>>, %arg9: memref<8x128xf32, #tpu.memory_space<vmem>>, %arg10: memref<8x16xf32, #tpu.memory_space<vmem>>) attributes {dimension_semantics = [#tpu.dimension_semantics<parallel>, #tpu.dimension_semantics<arbitrary>], iteration_bounds = array<i64: 2, 1>, scalar_prefetch = 0 : i64, scratch_operands = 1 : i64, tpu.core_type = #tpu.core_type<tc>, window_params = [{transform_indices = @transform_0, window_bounds = array<i64: 8, 32>}, {pipeline_mode = #tpu.pipeline_mode<synchronous>, transform_indices = @transform_1, window_bounds = array<i64: 32, 16>}, {pipeline_mode = #tpu.pipeline_mode<synchronous>, transform_indices = @transform_2, window_bounds = array<i64: 1, 16>}, {pipeline_mode = #tpu.pipeline_mode<synchronous>, transform_indices = @transform_3, window_bounds = array<i64: 1, 16>}, {pipeline_mode = #tpu.pipeline_mode<synchronous>, transform_indices = @transform_4, window_bounds = array<i64: 1, 16>}, {pipeline_mode = #tpu.pipeline_mode<synchronous>, transform_indices = @transform_5, window_bounds = array<i64: 16, 128>}, {pipeline_mode = #tpu.pipeline_mode<synchronous>, transform_indices = @transform_6, window_bounds = array<i64: 1, 128>}, {transform_indices = @transform_7, window_bounds = array<i64: 8, 128>}]} {
    %c0_i32 = arith.constant 0 : i32
    %0 = arith.cmpi eq, %arg1, %c0_i32 : i32
    %1 = arith.extui %0 : i1 to i32
    %c0_i32_0 = arith.constant 0 : i32
    %2 = arith.cmpi ne, %1, %c0_i32_0 : i32
    scf.if %2 {
      %cst_10 = arith.constant 0.000000e+00 : f32
      %12 = vector.broadcast %cst_10 : f32 to vector<8x16xf32>
      %c0_11 = arith.constant 0 : index
      %c0_12 = arith.constant 0 : index
      %13 = vector.load %arg10[%c0_11, %c0_12] : memref<8x16xf32, #tpu.memory_space<vmem>>, vector<8x16xf32>
      tpu.vector_store %arg10[%c0_11, %c0_12], %12 {strides = array<i32>} : memref<8x16xf32, #tpu.memory_space<vmem>>, vector<8x16xf32>,
    } else {
    }
    %c0 = arith.constant 0 : index
    %c0_1 = arith.constant 0 : index
    %3 = vector.load %arg10[%c0, %c0_1] : memref<8x16xf32, #tpu.memory_space<vmem>>, vector<8x16xf32>
    %c0_2 = arith.constant 0 : index
    %c0_3 = arith.constant 0 : index
    %4 = vector.load %arg2[%c0_2, %c0_3] : memref<8x32xbf16, #tpu.memory_space<vmem>>, vector<8x32xbf16>
    %c0_4 = arith.constant 0 : index
    %c0_5 = arith.constant 0 : index
    %5 = vector.load %arg3[%c0_4, %c0_5] : memref<32x16xbf16, #tpu.memory_space<vmem>>, vector<32x16xbf16>
    %cst = arith.constant dense<0.000000e+00> : vector<8x16xf32>
    %6 = tpu.matmul %4, %5, %cst {dimension_numbers = #tpu.dot_dimension_numbers<[1], [0], [0], [1], [0, 0, 1, 1], [], []>} : vector<8x32xbf16>, vector<32x16xbf16>, vector<8x16xf32> -> vector<8x16xf32>
    %7 = arith.addf %3, %6 : vector<8x16xf32>
    %c0_6 = arith.constant 0 : index
    %c0_7 = arith.constant 0 : index
    %8 = vector.load %arg10[%c0_6, %c0_7] : memref<8x16xf32, #tpu.memory_space<vmem>>, vector<8x16xf32>
    tpu.vector_store %arg10[%c0_6, %c0_7], %7 {strides = array<i32>} : memref<8x16xf32, #tpu.memory_space<vmem>>, vector<8x16xf32>,
    %c0_i32_8 = arith.constant 0 : i32
    %9 = arith.cmpi eq, %arg1, %c0_i32_8 : i32
    %10 = arith.extui %9 : i1 to i32
    %c0_i32_9 = arith.constant 0 : i32
    %11 = arith.cmpi ne, %10, %c0_i32_9 : i32
    scf.if %11 {
      %c0_10 = arith.constant 0 : index
      %c0_11 = arith.constant 0 : index
      %12 = vector.load %arg10[%c0_10, %c0_11] : memref<8x16xf32, #tpu.memory_space<vmem>>, vector<8x16xf32>
      %c0_12 = arith.constant 0 : index
      %c0_13 = arith.constant 0 : index
      %13 = vector.load %arg4[%c0_12, %c0_13] : memref<1x16xf32, #tpu.memory_space<vmem>>, vector<1x16xf32>
      %14 = vector.broadcast %13 : vector<1x16xf32> to vector<8x16xf32>
      %15 = arith.addf %12, %14 : vector<8x16xf32>
      %cst_14 = arith.constant 0.000000e+00 : f32
      %16 = vector.broadcast %cst_14 : f32 to vector<8x16xf32>
      %17 = arith.maximumf %15, %16 : vector<8x16xf32>
      %cst_15 = arith.constant dense<0.000000e+00> : vector<8xf32>
      %18 = vector.multi_reduction <add>, %17, %cst_15 [1] : vector<8x16xf32> to vector<8xf32>
      %19 = vector.shape_cast %18 : vector<8xf32> to vector<8x1xf32>
      %20 = arith.mulf %17, %17 : vector<8x16xf32>
      %cst_16 = arith.constant dense<0.000000e+00> : vector<8xf32>
      %21 = vector.multi_reduction <add>, %20, %cst_16 [1] : vector<8x16xf32> to vector<8xf32>
      %22 = vector.shape_cast %21 : vector<8xf32> to vector<8x1xf32>
      %cst_17 = arith.constant 6.250000e-02 : f32
      %23 = vector.broadcast %cst_17 : f32 to vector<8x1xf32>
      %24 = arith.mulf %19, %23 : vector<8x1xf32>
      %cst_18 = arith.constant 6.250000e-02 : f32
      %25 = vector.broadcast %cst_18 : f32 to vector<8x1xf32>
      %26 = arith.mulf %22, %25 : vector<8x1xf32>
      %27 = arith.mulf %24, %24 : vector<8x1xf32>
      %28 = arith.subf %26, %27 : vector<8x1xf32>
      %cst_19 = arith.constant 0.000000e+00 : f32
      %29 = vector.broadcast %cst_19 : f32 to vector<8x1xf32>
      %30 = arith.maximumf %28, %29 : vector<8x1xf32>
      %cst_20 = arith.constant 9.99999974E-6 : f32
      %31 = vector.broadcast %cst_20 : f32 to vector<8x1xf32>
      %32 = arith.addf %30, %31 : vector<8x1xf32>
      %33 = math.rsqrt %32 : vector<8x1xf32>
      %34 = vector.broadcast %24 : vector<8x1xf32> to vector<8x16xf32>
      %35 = arith.subf %17, %34 : vector<8x16xf32>
      %c0_21 = arith.constant 0 : index
      %c0_22 = arith.constant 0 : index
      %36 = vector.load %arg5[%c0_21, %c0_22] : memref<1x16xf32, #tpu.memory_space<vmem>>, vector<1x16xf32>
      %37 = vector.broadcast %33 : vector<8x1xf32> to vector<8x16xf32>
      %38 = vector.broadcast %36 : vector<1x16xf32> to vector<8x16xf32>
      %39 = arith.mulf %37, %38 : vector<8x16xf32>
      %40 = arith.mulf %35, %39 : vector<8x16xf32>
      %c0_23 = arith.constant 0 : index
      %c0_24 = arith.constant 0 : index
      %41 = vector.load %arg6[%c0_23, %c0_24] : memref<1x16xf32, #tpu.memory_space<vmem>>, vector<1x16xf32>
      %42 = vector.broadcast %41 : vector<1x16xf32> to vector<8x16xf32>
      %43 = arith.addf %40, %42 : vector<8x16xf32>
      %44 = arith.truncf %43 : vector<8x16xf32> to vector<8x16xbf16>
      %c0_25 = arith.constant 0 : index
      %c0_26 = arith.constant 0 : index
      %45 = vector.load %arg7[%c0_25, %c0_26] : memref<16x128xbf16, #tpu.memory_space<vmem>>, vector<16x128xbf16>
      %cst_27 = arith.constant dense<0.000000e+00> : vector<8x128xf32>
      %46 = tpu.matmul %44, %45, %cst_27 {dimension_numbers = #tpu.dot_dimension_numbers<[1], [0], [0], [1], [0, 0, 1, 1], [], []>} : vector<8x16xbf16>, vector<16x128xbf16>, vector<8x128xf32> -> vector<8x128xf32>
      %c0_28 = arith.constant 0 : index
      %c0_29 = arith.constant 0 : index
      %47 = vector.load %arg8[%c0_28, %c0_29] : memref<1x128xf32, #tpu.memory_space<vmem>>, vector<1x128xf32>
      %48 = vector.broadcast %47 : vector<1x128xf32> to vector<8x128xf32>
      %49 = arith.addf %46, %48 : vector<8x128xf32>
      %c0_30 = arith.constant 0 : index
      %c0_31 = arith.constant 0 : index
      %50 = vector.load %arg9[%c0_30, %c0_31] : memref<8x128xf32, #tpu.memory_space<vmem>>, vector<8x128xf32>
      tpu.vector_store %arg9[%c0_30, %c0_31], %49 {strides = array<i32>} : memref<8x128xf32, #tpu.memory_space<vmem>>, vector<8x128xf32>,
    } else {
    }
    return
  }
  func.func @transform_0(%arg0: i32, %arg1: i32) -> (i32, i32) {
    %c0_i32 = arith.constant 0 : i32
    return %arg0, %arg1 : i32, i32
  }
  func.func @transform_1(%arg0: i32, %arg1: i32) -> (i32, i32) {
    %c0_i32 = arith.constant 0 : i32
    %c0_i32_0 = arith.constant 0 : i32
    %c0_i32_1 = arith.constant 0 : i32
    return %c0_i32, %c0_i32_0 : i32, i32
  }
  func.func @transform_2(%arg0: i32, %arg1: i32) -> (i32, i32) {
    %c0_i32 = arith.constant 0 : i32
    %c0_i32_0 = arith.constant 0 : i32
    %c0_i32_1 = arith.constant 0 : i32
    return %c0_i32, %c0_i32_0 : i32, i32
  }
  func.func @transform_3(%arg0: i32, %arg1: i32) -> (i32, i32) {
    %c0_i32 = arith.constant 0 : i32
    %c0_i32_0 = arith.constant 0 : i32
    %c0_i32_1 = arith.constant 0 : i32
    return %c0_i32, %c0_i32_0 : i32, i32
  }
  func.func @transform_4(%arg0: i32, %arg1: i32) -> (i32, i32) {
    %c0_i32 = arith.constant 0 : i32
    %c0_i32_0 = arith.constant 0 : i32
    %c0_i32_1 = arith.constant 0 : i32
    return %c0_i32, %c0_i32_0 : i32, i32
  }
  func.func @transform_5(%arg0: i32, %arg1: i32) -> (i32, i32) {
    %c0_i32 = arith.constant 0 : i32
    %c0_i32_0 = arith.constant 0 : i32
    %c0_i32_1 = arith.constant 0 : i32
    return %c0_i32, %c0_i32_0 : i32, i32
  }
  func.func @transform_6(%arg0: i32, %arg1: i32) -> (i32, i32) {
    %c0_i32 = arith.constant 0 : i32
    %c0_i32_0 = arith.constant 0 : i32
    %c0_i32_1 = arith.constant 0 : i32
    return %c0_i32, %c0_i32_0 : i32, i32
  }
  func.func @transform_7(%arg0: i32, %arg1: i32) -> (i32, i32) {
    %c0_i32 = arith.constant 0 : i32
    %c0_i32_0 = arith.constant 0 : i32
    return %arg0, %c0_i32 : i32, i32
  }
}

</mosaic_0001>

<bundles_post_ra>
// kernel: tpu_custom_call.1
= control target key start
LH: loop header
LB: loop body
LE: loop exit
PB: predicated region body
PF: predicated region fallthrough
CT: control target
= control target key end

     0   :  { %12 = vsyncpa [#allocation4], 0  ;;  %s917_s0 = inlined_call_operand.vmem [shape: bf16[16,32], index: 0, kind: input, shape index: {}]   ;;  %s918_s1 = inlined_call_operand.vmem [shape: bf16[32,16], index: 1, kind: input, shape index: {}]   ;;  %s919_s2 = inlined_call_operand.vmem [shape: f32[1,16], index: 2, kind: input, shape index: {}]   ;;  %s920_s3 = inlined_call_operand.vmem [shape: f32[1,16], index: 3, kind: input, shape index: {}]   ;;  %s921_s4 = inlined_call_operand.vmem [shape: f32[1,16], index: 4, kind: input, shape index: {}]   ;;  %s922_s5 = inlined_call_operand.vmem [shape: bf16[16,128], index: 5, kind: input, shape index: {}]   ;;  %s923_s6 = inlined_call_operand.vmem [shape: f32[1,128], index: 6, kind: input, shape index: {}]   ;;  %s924_s7 = inlined_call_operand.hbm [shape: f32[16,128], index: 7, kind: output, shape index: {}]  }
   0x1   :  { %14 = vsyncpa [#allocation4 + $0x1], 0  ;;  %s780_s24 = smov 0   ;;  %s782_s25 = smov 0  }
   0x2   :  { %s784_s26 = smov 0   ;;  %s786_s27 = smov 0  }
   0x3   :  { %s788_s28 = smov 0   ;;  %s790_s29 = smov 0  }
   0x4 LB: > { %s558_s30 = sadd.s32 4294967295, %s735_s29   ;;  %s559_s8 = sadd.s32 4294967294, %s735_s29   ;;  %s735_s29 = sphi %s790_s29, %s20_s29   ;;  %s731_s28 = sphi %s788_s28, %s931_s28   ;;  %s727_s27 = sphi %s786_s27, %s930_s27   ;;  %s723_s26 = sphi %s784_s26, %s929_s26   ;;  %s719_s25 = sphi %s782_s25, %s928_s25   ;;  %s715_s24 = sphi %s780_s24, %s927_s24  }
   0x5   : > { %s32_s9 = sadd.s32 1, %s731_s28  ;;  %s193_s10 = sadd.s32 1, %s723_s26 }
   0x6   : > { %p34_p0 = scmp.ge.s32.totalorder %s32_s9, 2  ;;  %p203_p1 = scmp.ne.s32.totalorder %s723_s26, %s719_s25 }
   0x7   : > { %p204_p2 = scmp.eq.s32.totalorder %s558_s30, 1  ;;  %p209_p3 = scmp.ne.s32.totalorder %s719_s25, %s715_s24 }
   0x8   : > { %s933_s9 = smov (%p34_p0, %s32_s9), 0  ;;  %p210_p5 = scmp.eq.s32.totalorder %s559_s8, 1 }
   0x9   : > { %p820_p4 = por %p204_p2, %p203_p1  ;;  %s190_s12 = ssub.s32 %s731_s28, %s933_s9 }
   0xa   : > { %p562_p6 = scmp.ge.s32.totalorder %s735_s29, 1  ;;  %p191_p7 = scmp.eq.s32.totalorder %s190_s12, 0 }
   0xb   : > { %p827_p8 = por %p210_p5, %p209_p3  ;;  %p256_p9 = scmp.lt.s32.totalorder %s735_s29, 3 }
   0xc   : > { %s833_s14 = scalar_select %p191_p7, %s723_s26, %s193_s10  }
   0xd   : > { %p257_p10 = pnand %p562_p6, %p256_p9 }
   0xe   : > { %p290_p11 = scmp.lt.s32.totalorder (!%p257_p10), %s727_s27, 1 }
   0xf   : > { %260 = sbr.rel (%p257_p10) target bundleno = 618 (0x26a), region = 48 }
  0x14   : > { %v654_v0 = vld [vmem:[%s918_s1 + $0x8] sm:$0xff]   ;;  %v737_v1 = vmov 0.0   ;;  %v655_v2 = vld [vmem:[%s918_s1] sm:$0xff]   ;;  %vm738_vm0 = vmmov 0   ;;  %vm302_vm1 = vcmask 130048   ;;  %s291_s19 = scalar_select %p290_p11, %s727_s27, 1 }
  0x15   : > { %583 = vmatprep.subr.bf16.mxu0 %v737_v1  ;;  %591 = vmatprep.subr.bf16.mxu1 %v737_v1  ;;  %303 = vst.msk [vmem:[#allocation2] sm:$0xff] %vm302_vm1, %v737_v1  ;;  %vm322_vm2 = vcmask 261120   ;;  %v568_v10 = vld [vmem:[%s919_s2] ss:$0 sm:$0xff] }
  0x16   : > { %584 = vmatpush3.bf16.msra.mxu0 %v654_v0  ;;  %587 = vmatprep.mubr.msk.bf16.mxu0 %vm738_vm0, %v737_v1  ;;  %s564_s20 = sshll.u32 %s291_s19, 2  ;;  %v656_v17 = vld [vmem:[%s922_s5] sm:$0xff]   ;;  %s287_s19 = sand.u32 1, %s719_s25  }
  0x17   : > { %585 = vmatprep.subr.bf16.mxu0 %v737_v1  ;;  %593 = vmatprep.mubr.msk.bf16.mxu1 %vm738_vm0, %v737_v1  ;;  %s296_s23 = scalar_lea.vmem %s917_s0, %s564_s20  ;;  %v569_v26 = vld [vmem:[%s920_s3] ss:$0 sm:$0xff]  ;;  %s563_s20 = sshll.u32 %s287_s19, 3 }
  0x18   : > { %v305_v3 = vld [vmem:[%s296_s23] sm:$0xf]  ;;  %592 = vmatpush3.bf16.msra.mxu1 %v656_v17  ;;  %s575_s23 = sshll.u32 %s727_s27, 7  ;;  %s289_s30 = scalar_lea.vmem [#allocation3], %s563_s20 }
  0x19   : > { %v570_v30 = vld [vmem:[%s921_s4] ss:$0 sm:$0xff]  ;;  %s488_s8 = sshll.u32 %s289_s30, 4  ;;  %s871_s15 = scalar_lea.hbm %s924_s7, %s575_s23  ;;  %s873_s8 = int_to_ptr.vmem [resolvable:$true] %s488_s8 }
  0x1a   : > { %586 = vmatpush3.bf16.msra.mxu0 %v655_v2  ;;  %v571_v34 = vld [vmem:[%s923_s6] ss:$0 sm:$0xff]  ;;  %s475_s16 = scalar_lea.sflag [#allocation4], %s287_s19  ;;  %s659_s17 = scalar_lea.vmem %s873_s8, 128 }
  0x1b   : > { %p660_p12 = scmp.ne.s32.totalorder %s873_s8, %s659_s17  ;;  %s739_s27 = smov [#allocation3]  }
  0x1c   : > { %v304_v4 = vld [vmem:[#allocation2] sm:$0xff]  ;;  %s663_s18 = sshll.u32 %s739_s27, 4  ;;  %s664_s18 = int_to_ptr.vmem [resolvable:$false] %s663_s18 }
  0x1d   : > { %588 = vmatmul.mubr.msk.bf16.vlgmr.msra.gmra.mxu0 %vm322_vm2, %v305_v3  ;;  %p661_p13 = pnand %p660_p12, %p820_p4  ;;  %s665_s20 = scalar_lea.vmem %s664_s18, 256 }
  0x1e   : > { %p666_p1 = scmp.lt.s32.totalorder %s873_s8, %s664_s18  ;;  %p667_p2 = scmp.lt.s32.totalorder %s665_s20, %s659_s17 }
  0x1f   : > { %p662_p0 = pneg %p661_p13 }
  0x20   : > { %p668_p3 = por %p667_p2, %p666_p1 }
  0x22   : > { %p669_p5 = pnand %p668_p3, %p662_p0 }
  0xdd   : > { %v360_v5 = vpop.f32.mrf.mxu0 }
  0xde   : > { %v366_v6 = vadd.f32 %v360_v5, %v304_v4 }
  0xdf   : > { %v589_v7 = vpop.f32.mrf.mxu0 }
  0xe0   : > { %368 = vst.msk [vmem:[#allocation2] sm:$0xff] %vm302_vm1, %v366_v6 }
  0xe1   : > { %v363_v8 = vpop.f32.mrf.mxu0 }
  0xe3   : > { %v590_v9 = vpop.f32.mrf.mxu0 }
  0xe7   : > { %v372_v11 = vld [vmem:[#allocation2] sm:$0xff] }
  0xe8   : > { %v380_v12 = vadd.f32 %v568_v10, %v372_v11 }
  0xea   : > { %v381_v13 = vmax.f32 %v380_v12, 0.0 }
  0xec   : > { %v382_v14 = vsel %vm302_vm1, %v381_v13, 0.0  ;;  %v385_v15 = vmul.f32 %v381_v13, %v381_v13 }
  0xed   : > { %383 = vadd.xlane.f32.xlu0 %v382_v14 }
  0xee   : > { %v386_v16 = vsel %vm302_vm1, %v385_v15, 0.0 }
  0xf1   : > { %387 = vadd.xlane.f32.xlu0 %v386_v16 }
 0x176   : > { %v384_v18 = vpop.xlane.xlu0 %383 }
 0x177   : > { %v389_v19 = vmul.f32 0.0625, %v384_v18 }
 0x179   : > { %v391_v21 = vmul.f32 %v389_v19, %v389_v19  ;;  %v396_v28 = vsub.f32 %v381_v13, %v389_v19 }
 0x17a   : > { %v388_v20 = vpop.xlane.xlu0 %387 }
 0x17b   : > { %v390_v22 = vmul.f32 0.0625, %v388_v20 }
 0x17d   : > { %v392_v23 = vsub.f32 %v390_v22, %v391_v21 }
 0x17f   : > { %v393_v24 = vmax.f32 %v392_v23, 0.0 }
 0x181   : > { %v394_v25 = vadd.f32 1e-05, %v393_v24 }
 0x183   : > { %657 = vrsqrt.f32 %v394_v25 }
 0x190   : > { %v658_v27 = vpop.eup %657 }
 0x191   : > { %v404_v29 = vmul.f32 %v658_v27, %v569_v26 }
 0x193   : > { %v405_v31 = vmul.f32 %v404_v29, %v396_v28 }
 0x195   : > { %v413_v32 = vadd.f32 %v570_v30, %v405_v31 }
 0x197   : > { %v414_v33 = vpack.c.bf16 %v413_v32, %v413_v32 }
 0x199   : > { %594 = vmatmul.mubr.msk.bf16.vlgmr.msra.gmra.mxu1 %vm302_vm1, %v414_v33 }
 0x259   : > { %v467_v35 = vpop.f32.mrf.mxu1 }
 0x25a   : > { %v468_v36 = vadd.f32 %v571_v34, %v467_v35 }
 0x25b   : > { %v595_v37 = vpop.f32.mrf.mxu1 }
 0x25c   : > { %473 = vst [vmem:[%s289_s30] sm:$0xff] %v468_v36 }
 0x25d   : > { %v470_v38 = vpop.f32.mrf.mxu1 }
 0x25e   : > { %672 = shalt.err (!%p669_p5)
}
 0x25f   : > { %s673_s21 = scalar_lea.hbm %s871_s15, 128  ;;  %s677_s23 = scalar_lea.hbm %s924_s7, 256 }
 0x260   : > { %p674_p6 = scmp.ne.s32.totalorder %s871_s15, %s673_s21  ;;  %p678_p10 = scmp.lt.s32.totalorder %s871_s15, %s924_s7 }
 0x261   : > { %p679_p11 = scmp.lt.s32.totalorder %s677_s23, %s673_s21 }
 0x262   : > { %p675_p7 = pnand %p674_p6, %p820_p4 }
 0x263   : > { %p680_p12 = por %p679_p11, %p678_p10 }
 0x264   : > { %p676_p9 = pneg %p675_p7 }
 0x266   : > { %p681_p13 = pnand %p680_p12, %p676_p9 }
 0x268   : > { %684 = shalt.err (!%p681_p13)
}
 0x269   : > { %597 = dma.vmem_to_hbm [thread:$0]  (%p820_p4), %s873_s8, 128, %s871_s15, %s475_s16   ;;  %v596_v39 = vpop.f32.mrf.mxu1 }
 0x26a PF: > { %p603_p0 = scmp.ge.s32.totalorder %s735_s29, 2  ;;  %s500_s12 = sand.u32 1, %s715_s24  }
 0x26b   : > { %s501_s17 = scalar_lea.sflag [#allocation4], %s500_s12 }
 0x26c   : > { %p600_p1 = pnand %p603_p0, %p827_p8 }
 0x26e   : > { %p601_p2 = pneg %p600_p1 }
 0x270   : > { %710 = dma.done.wait (%p601_p2), %s501_s17, 128  }
 0x271   : > { %712 = vsyncadd (%p601_p2), %s501_s17, 4294967168  ;;  %s20_s29 = sadd.s32 1, %s735_s29   ;;  %s927_s24 = smov %s719_s25 }
 0x272   : > { %p17_p3 = scmp.ge.s32.totalorder %s20_s29, 4   ;;  %s928_s25 = smov %s723_s26 }
 0x273   : > { %s929_s26 = smov %s833_s14  ;;  %s930_s27 = smov %s731_s28 }
 0x274   : > { %s931_s28 = smov %s933_s9  ;;  %19 = sbr.rel (!%p17_p3) target bundleno = 4 (0x4), region = 91 }
 0x279   :  { %506 = vsyncpa [#allocation4], 1 }
 0x27a   :  { %508 = vsyncpa [#allocation4 + $0x1], 1 }

</bundles_post_ra>
